<compile_context>
chip_gen: v7x
topology: tpu7x:2x2x1
jax: 0.10.0
libtpu: 0.0.40
codegen_flags: <defaults>
</compile_context>

<pallas_src>
import jax
import jax.numpy as jnp
from jax.experimental import pallas as pl
from jax.experimental.pallas import tpu as pltpu

INPUT_DIM = 28 * 28   # 784
HIDDEN_DIM = 100
OUTPUT_DIM = 10

HIDDEN_PAD = 128      # lane-dense hidden width
OUTPUT_PAD = 128      # lane-dense output width


def _round_up(a: int, m: int) -> int:
    return ((a + m - 1) // m) * m


def mlp_kernel(x_ref, w1_ref, b1_ref, w2_ref, b2_ref, o_ref):
    # fc1: (TB, 784)bf16 @ (784, 128)bf16 -> (TB, 128) f32 accumulation on MXU
    h = jnp.dot(x_ref[...], w1_ref[...], preferred_element_type=jnp.float32)
    h = jnp.tanh(h + b1_ref[...])                       # f32 bias + EUP tanh
    # fc2: (TB, 128)bf16 @ (128, 128)bf16 -> (TB, 128) f32 accumulation
    out = jnp.dot(h.astype(jnp.bfloat16), w2_ref[...],
                  preferred_element_type=jnp.float32)
    o_ref[...] = (out + b2_ref[...]).astype(o_ref.dtype)


def feedforward_forward(x, w1, b1, w2, b2, *, batch_tile=512):
    """x: (B, 784) f32; w1: (784, 100); b1: (100,); w2: (100, 10); b2: (10,)."""
    B, D = x.shape
    assert D == INPUT_DIM

    # Effective batch tile: multiple of 8 (sublane), no bigger than needed.
    bt = _round_up(min(batch_tile, B), 8)
    Bp = _round_up(B, bt)

    # --- wrapper-side padding / casting -------------------------------------
    xb = x.astype(jnp.bfloat16)
    if Bp != B:
        xb = jnp.pad(xb, ((0, Bp - B), (0, 0)))

    # Zero-pad hidden/output dims to 128 lanes; extra columns/rows contribute 0.
    w1p = jnp.zeros((INPUT_DIM, HIDDEN_PAD), jnp.bfloat16)
    w1p = w1p.at[:, :HIDDEN_DIM].set(w1.astype(jnp.bfloat16))
    b1p = jnp.zeros((1, HIDDEN_PAD), jnp.float32)
    b1p = b1p.at[:, :HIDDEN_DIM].set(b1.reshape(1, HIDDEN_DIM).astype(jnp.float32))

    w2p = jnp.zeros((HIDDEN_PAD, OUTPUT_PAD), jnp.bfloat16)
    w2p = w2p.at[:HIDDEN_DIM, :OUTPUT_DIM].set(w2.astype(jnp.bfloat16))
    b2p = jnp.zeros((1, OUTPUT_PAD), jnp.float32)
    b2p = b2p.at[:, :OUTPUT_DIM].set(b2.reshape(1, OUTPUT_DIM).astype(jnp.float32))
    # ------------------------------------------------------------------------

    grid = (Bp // bt,)

    out = pl.pallas_call(
        mlp_kernel,
        out_shape=jax.ShapeDtypeStruct((Bp, OUTPUT_PAD), jnp.float32),
        grid_spec=pltpu.PrefetchScalarGridSpec(
            num_scalar_prefetch=0,
            grid=grid,
            in_specs=[
                # streamed, batch-tiled activations (bf16)
                pl.BlockSpec((bt, INPUT_DIM), lambda i: (i, 0)),
                # weights / biases: full blocks, resident across grid steps
                pl.BlockSpec((INPUT_DIM, HIDDEN_PAD), lambda i: (0, 0)),
                pl.BlockSpec((1, HIDDEN_PAD), lambda i: (0, 0)),
                pl.BlockSpec((HIDDEN_PAD, OUTPUT_PAD), lambda i: (0, 0)),
                pl.BlockSpec((1, OUTPUT_PAD), lambda i: (0, 0)),
            ],
            # lane-dense (128-wide) output block -> unmasked stores
            out_specs=pl.BlockSpec((bt, OUTPUT_PAD), lambda i: (i, 0)),
        ),
        compiler_params=pltpu.CompilerParams(
            dimension_semantics=("parallel",)),
    )(xb, w1p, b1p, w2p, b2p)

    # Slice away batch padding and the padded output lanes.
    return out[:B, :OUTPUT_DIM]


def reference_forward(x, w1, b1, w2, b2):
    h = jnp.tanh(x @ w1 + b1)
    return h @ w2 + b2


if __name__ == "__main__":
    key = jax.random.PRNGKey(0)
    kx, k1, kb1, k2, kb2 = jax.random.split(key, 5)

    B = 32  # small demo batch (wrapper handles arbitrary B via padding)
    x = jax.random.normal(kx, (B, INPUT_DIM), dtype=jnp.float32)

    # Params stored as (in_dim, out_dim) (transposed vs. PyTorch's (out, in)).
    w1 = jax.random.normal(k1, (INPUT_DIM, HIDDEN_DIM), dtype=jnp.float32) * 0.02
    b1 = jax.random.normal(kb1, (HIDDEN_DIM,), dtype=jnp.float32) * 0.02
    w2 = jax.random.normal(k2, (HIDDEN_DIM, OUTPUT_DIM), dtype=jnp.float32) * 0.02
    b2 = jax.random.normal(kb2, (OUTPUT_DIM,), dtype=jnp.float32) * 0.02

    out = feedforward_forward(x, w1, b1, w2, b2)
    out = jax.block_until_ready(out)

    ref = reference_forward(x, w1, b1, w2, b2)
    assert out.shape == (B, OUTPUT_DIM)
    # bf16 matmul inputs with f32 accumulation -> small tolerance vs f32 ref.
    assert jnp.allclose(out, ref, atol=2e-2, rtol=2e-2), \
        float(jnp.max(jnp.abs(out - ref)))

    print("KERNEL_OK")
</pallas_src>

<mosaic_0001>
module attributes {stable_mosaic.version = 11 : i64} {
  func.func @mlp_kernel(%arg0: i32, %arg1: memref<32x784xbf16, #tpu.memory_space<vmem>>, %arg2: memref<784x128xbf16, #tpu.memory_space<vmem>>, %arg3: memref<1x128xf32, #tpu.memory_space<vmem>>, %arg4: memref<128x128xbf16, #tpu.memory_space<vmem>>, %arg5: memref<1x128xf32, #tpu.memory_space<vmem>>, %arg6: memref<32x128xf32, #tpu.memory_space<vmem>>) attributes {dimension_semantics = [#tpu.dimension_semantics<parallel>], iteration_bounds = array<i64: 1>, scalar_prefetch = 0 : i64, scratch_operands = 0 : i64, tpu.core_type = #tpu.core_type<tc>, window_params = [{transform_indices = @transform_0, window_bounds = array<i64: 32, 784>}, {pipeline_mode = #tpu.pipeline_mode<synchronous>, transform_indices = @transform_1, window_bounds = array<i64: 784, 128>}, {pipeline_mode = #tpu.pipeline_mode<synchronous>, transform_indices = @transform_2, window_bounds = array<i64: 1, 128>}, {pipeline_mode = #tpu.pipeline_mode<synchronous>, transform_indices = @transform_3, window_bounds = array<i64: 128, 128>}, {pipeline_mode = #tpu.pipeline_mode<synchronous>, transform_indices = @transform_4, window_bounds = array<i64: 1, 128>}, {transform_indices = @transform_5, window_bounds = array<i64: 32, 128>}]} {
    %c0 = arith.constant 0 : index
    %c0_0 = arith.constant 0 : index
    %0 = vector.load %arg1[%c0, %c0_0] : memref<32x784xbf16, #tpu.memory_space<vmem>>, vector<32x784xbf16>
    %c0_1 = arith.constant 0 : index
    %c0_2 = arith.constant 0 : index
    %1 = vector.load %arg2[%c0_1, %c0_2] : memref<784x128xbf16, #tpu.memory_space<vmem>>, vector<784x128xbf16>
    %cst = arith.constant dense<0.000000e+00> : vector<32x128xf32>
    %2 = tpu.matmul %0, %1, %cst {dimension_numbers = #tpu.dot_dimension_numbers<[1], [0], [0], [1], [0, 0, 1, 1], [], []>} : vector<32x784xbf16>, vector<784x128xbf16>, vector<32x128xf32> -> vector<32x128xf32>
    %c0_3 = arith.constant 0 : index
    %c0_4 = arith.constant 0 : index
    %3 = vector.load %arg3[%c0_3, %c0_4] : memref<1x128xf32, #tpu.memory_space<vmem>>, vector<1x128xf32>
    %4 = vector.broadcast %3 : vector<1x128xf32> to vector<32x128xf32>
    %5 = arith.addf %2, %4 : vector<32x128xf32>
    %6 = math.tanh %5 : vector<32x128xf32>
    %7 = arith.truncf %6 : vector<32x128xf32> to vector<32x128xbf16>
    %c0_5 = arith.constant 0 : index
    %c0_6 = arith.constant 0 : index
    %8 = vector.load %arg4[%c0_5, %c0_6] : memref<128x128xbf16, #tpu.memory_space<vmem>>, vector<128x128xbf16>
    %cst_7 = arith.constant dense<0.000000e+00> : vector<32x128xf32>
    %9 = tpu.matmul %7, %8, %cst_7 {dimension_numbers = #tpu.dot_dimension_numbers<[1], [0], [0], [1], [0, 0, 1, 1], [], []>} : vector<32x128xbf16>, vector<128x128xbf16>, vector<32x128xf32> -> vector<32x128xf32>
    %c0_8 = arith.constant 0 : index
    %c0_9 = arith.constant 0 : index
    %10 = vector.load %arg5[%c0_8, %c0_9] : memref<1x128xf32, #tpu.memory_space<vmem>>, vector<1x128xf32>
    %11 = vector.broadcast %10 : vector<1x128xf32> to vector<32x128xf32>
    %12 = arith.addf %9, %11 : vector<32x128xf32>
    %c0_10 = arith.constant 0 : index
    %c0_11 = arith.constant 0 : index
    %13 = vector.load %arg6[%c0_10, %c0_11] : memref<32x128xf32, #tpu.memory_space<vmem>>, vector<32x128xf32>
    tpu.vector_store %arg6[%c0_10, %c0_11], %12 {strides = array<i32>} : memref<32x128xf32, #tpu.memory_space<vmem>>, vector<32x128xf32>,
    return
  }
  func.func @transform_0(%arg0: i32) -> (i32, i32) {
    %c0_i32 = arith.constant 0 : i32
    %c0_i32_0 = arith.constant 0 : i32
    return %arg0, %c0_i32 : i32, i32
  }
  func.func @transform_1(%arg0: i32) -> (i32, i32) {
    %c0_i32 = arith.constant 0 : i32
    %c0_i32_0 = arith.constant 0 : i32
    %c0_i32_1 = arith.constant 0 : i32
    return %c0_i32, %c0_i32_0 : i32, i32
  }
  func.func @transform_2(%arg0: i32) -> (i32, i32) {
    %c0_i32 = arith.constant 0 : i32
    %c0_i32_0 = arith.constant 0 : i32
    %c0_i32_1 = arith.constant 0 : i32
    return %c0_i32, %c0_i32_0 : i32, i32
  }
  func.func @transform_3(%arg0: i32) -> (i32, i32) {
    %c0_i32 = arith.constant 0 : i32
    %c0_i32_0 = arith.constant 0 : i32
    %c0_i32_1 = arith.constant 0 : i32
    return %c0_i32, %c0_i32_0 : i32, i32
  }
  func.func @transform_4(%arg0: i32) -> (i32, i32) {
    %c0_i32 = arith.constant 0 : i32
    %c0_i32_0 = arith.constant 0 : i32
    %c0_i32_1 = arith.constant 0 : i32
    return %c0_i32, %c0_i32_0 : i32, i32
  }
  func.func @transform_5(%arg0: i32) -> (i32, i32) {
    %c0_i32 = arith.constant 0 : i32
    %c0_i32_0 = arith.constant 0 : i32
    return %arg0, %c0_i32 : i32, i32
  }
}

</mosaic_0001>

<bundles_post_ra>
// kernel: tpu_custom_call.1
= control target key start
LH: loop header
LB: loop body
LE: loop exit
PB: predicated region body
PF: predicated region fallthrough
CT: control target
= control target key end

     0   :  { %10 = vsyncpa [#allocation3], 0  ;;  %s1386_s0 = inlined_call_operand.hbm [shape: bf16[32,784], index: 0, kind: input, shape index: {}]   ;;  %s1387_s1 = inlined_call_operand.hbm [shape: bf16[784,128], index: 1, kind: input, shape index: {}]   ;;  %s1388_s2 = inlined_call_operand.vmem [shape: f32[1,128], index: 2, kind: input, shape index: {}]   ;;  %s1389_s3 = inlined_call_operand.hbm [shape: bf16[128,128], index: 3, kind: input, shape index: {}]   ;;  %s1390_s4 = inlined_call_operand.vmem [shape: f32[1,128], index: 4, kind: input, shape index: {}]   ;;  %s1391_s5 = inlined_call_operand.hbm [shape: f32[32,128], index: 5, kind: output, shape index: {}]  }
   0x1   :  { %11 = vsyncpa [#allocation6], 0 }
   0x2   :  { %12 = vsyncpa [#allocation4], 0  ;;  %s1286_s18 = smov [#allocation5]   ;;  %s1192_s22 = scalar_lea.hbm %s1387_s1, 6272 }
   0x3   :  { %s30_s19 = sshll.u32 %s1286_s18, 4  ;;  %p1193_p0 = scmp.ne.s32.totalorder %s1387_s1, %s1192_s22  ;;  %s31_s19 = int_to_ptr.vmem [resolvable:$true] %s30_s19 }
   0x4   :  { %p1196_p1 = scmp.lt.u32.totalorder %s1192_s22, %s1387_s1 }
   0x6   :  { %p1198_p2 = pnand %p1196_p1, %p1193_p0 }
   0x8   :  { %1201 = shalt.err (!%p1198_p2)
}
   0x9   :  { %s1202_s27 = scalar_lea.vmem %s31_s19, 6272  ;;  %p1207_p4 = scmp.lt.s32.totalorder %s31_s19, %s31_s19 }
   0xa   :  { %p1203_p3 = scmp.ne.s32.totalorder %s31_s19, %s1202_s27  ;;  %p1208_p5 = scmp.lt.s32.totalorder %s1202_s27, %s1202_s27 }
   0xc   :  { %p1209_p6 = por %p1208_p5, %p1207_p4 }
   0xe   :  { %p1210_p7 = pnand %p1209_p6, %p1203_p3 }
  0x10   :  { %1213 = shalt.err (!%p1210_p7)
}
  0x11   :  { %s1287_s28 = smov 64   ;;  %s1288_s29 = smov 4  }
  0x12   :  { %36 = dma.hbm_to_vmem [thread:$0]  %s1387_s1, 6272, %s31_s19, [#allocation6], %s1287_s28, %s1287_s28, %s1288_s29  }
  0x13   :  { %s1289_s7 = smov [#allocation2]   ;;  %s1214_s11 = scalar_lea.hbm %s1386_s0, 1792 }
  0x14   :  { %s18_s8 = sshll.u32 %s1289_s7, 4  ;;  %p1215_p8 = scmp.ne.s32.totalorder %s1386_s0, %s1214_s11  ;;  %s19_s8 = int_to_ptr.vmem [resolvable:$true] %s18_s8 }
  0x15   :  { %p1218_p9 = scmp.lt.u32.totalorder %s1214_s11, %s1386_s0 }
  0x17   :  { %p1220_p10 = pnand %p1218_p9, %p1215_p8 }
  0x19   :  { %1223 = shalt.err (!%p1220_p10)
}
  0x1a   :  { %s1224_s16 = scalar_lea.vmem %s19_s8, 1792  ;;  %p1229_p12 = scmp.lt.s32.totalorder %s19_s8, %s19_s8 }
  0x1b   :  { %p1225_p11 = scmp.ne.s32.totalorder %s19_s8, %s1224_s16  ;;  %p1230_p13 = scmp.lt.s32.totalorder %s1224_s16, %s1224_s16 }
  0x1d   :  { %p1231_p0 = por %p1230_p13, %p1229_p12 }
  0x1f   :  { %p1232_p1 = pnand %p1231_p0, %p1225_p11 }
  0x21   :  { %1235 = shalt.err (!%p1232_p1)
}
  0x22   :  { %s1290_s1 = smov 448   ;;  %s1291_s17 = smov 28  }
  0x23   :  { %24 = dma.hbm_to_vmem [thread:$0]  %s1386_s0, 1792, %s19_s8, [#allocation3], %s1290_s1, %s1290_s1, %s1291_s17  }
  0x24   :  { %s1292_s20 = smov [#allocation7]   ;;  %s1236_s24 = scalar_lea.hbm %s1389_s3, 1024 }
  0x25   :  { %s44_s21 = sshll.u32 %s1292_s20, 4  ;;  %p1237_p2 = scmp.ne.s32.totalorder %s1389_s3, %s1236_s24  ;;  %s45_s21 = int_to_ptr.vmem [resolvable:$true] %s44_s21 }
  0x26   :  { %p1240_p3 = scmp.lt.u32.totalorder %s1236_s24, %s1389_s3 }
  0x28   :  { %p1242_p4 = pnand %p1240_p3, %p1237_p2 }
  0x2a   :  { %1245 = shalt.err (!%p1242_p4)
}
  0x2b   :  { %s1246_s6 = scalar_lea.vmem %s45_s21, 1024  ;;  %p1251_p6 = scmp.lt.s32.totalorder %s45_s21, %s45_s21 }
  0x2c   :  { %p1247_p5 = scmp.ne.s32.totalorder %s45_s21, %s1246_s6  ;;  %p1252_p7 = scmp.lt.s32.totalorder %s1246_s6, %s1246_s6 }
  0x2e   :  { %p1253_p8 = por %p1252_p7, %p1251_p6 }
  0x30   :  { %p1254_p9 = pnand %p1253_p8, %p1247_p5 }
  0x32   :  { %1257 = shalt.err (!%p1254_p9)
}
  0x33   :  { %50 = dma.hbm_to_vmem [thread:$0]  %s1389_s3, 1024, %s45_s21, [#allocation6], %s1287_s28, %s1287_s28, %s1288_s29  }
  0x34   :  { %1280 = dma.done.wait [#allocation3], 1792  }
  0x35   :  { %1281 = vsyncadd [#allocation3], 4294965504 }
  0x36   :  { %1282 = dma.done.wait [#allocation6], 7296  }
  0x37   :  { %1283 = vsyncadd [#allocation6], 4294960000  ;;  %v1107_v0 = vld [vmem:[#allocation5 + $0x40] sm:$0xff]   ;;  %v1111_v4 = vld [vmem:[#allocation5 + $0x48] sm:$0xff]   ;;  %vm548_vm0 = vcmask 130048   ;;  %s1293_s8 = smov [#allocation8]  }
  0x38   :  { %v1108_v1 = vld [vmem:[#allocation5] sm:$0xff]   ;;  %974 = vmatprep.subr.bf16.mxu0 %v1107_v0  ;;  %v1112_v5 = vld [vmem:[#allocation5 + $0x8] sm:$0xff]   ;;  %v1115_v8 = vld [vmem:[#allocation5 + $0x50] sm:$0xff]   ;;  %s886_s9 = sshll.u32 %s1293_s8, 4  ;;  %s887_s9 = int_to_ptr.vmem [resolvable:$true] %s886_s9 }
  0x39   :  { %v1109_v2 = vld [vmem:[#allocation5 + $0xc0] sm:$0xff]   ;;  %975 = vmatpush3.bf16.msra.mxu0 %v1108_v1  ;;  %v1113_v6 = vld [vmem:[#allocation5 + $0xc8] sm:$0xff]   ;;  %v1116_v9 = vld [vmem:[#allocation5 + $0x10] sm:$0xff]   ;;  %s1258_s10 = scalar_lea.vmem %s887_s9, 512  ;;  %p1263_p11 = scmp.lt.s32.totalorder %s887_s9, %s887_s9 }
  0x3a   :  { %v1110_v3 = vld [vmem:[#allocation5 + $0x80] sm:$0xff]   ;;  %1002 = vmatprep.subr.bf16.mxu1 %v1109_v2  ;;  %976 = vmatprep.subr.bf16.mxu0 %v1111_v4  ;;  %v1114_v7 = vld [vmem:[#allocation5 + $0x88] sm:$0xff]   ;;  %v1117_v10 = vld [vmem:[#allocation5 + $0xd0] sm:$0xff]   ;;  %p1259_p10 = scmp.ne.s32.totalorder %s887_s9, %s1258_s10  ;;  %p1264_p12 = scmp.lt.s32.totalorder %s1258_s10, %s1258_s10 }
  0x3b   :  { %1003 = vmatpush3.bf16.msra.mxu1 %v1110_v3  ;;  %v1118_v11 = vld [vmem:[#allocation5 + $0x90] sm:$0xff]   ;;  %v1119_v12 = vld [vmem:[#allocation5 + $0x58] sm:$0xff]   ;;  %v1123_v16 = vld [vmem:[#allocation5 + $0x60] sm:$0xff]  }
  0x3c   :  { %1004 = vmatprep.subr.bf16.mxu1 %v1113_v6  ;;  %v1120_v13 = vld [vmem:[#allocation5 + $0x18] sm:$0xff]   ;;  %v1124_v17 = vld [vmem:[#allocation5 + $0x20] sm:$0xff]   ;;  %v1127_v20 = vld [vmem:[#allocation5 + $0x68] sm:$0xff]   ;;  %p1265_p13 = por %p1264_p12, %p1263_p11 }
  0x3d   :  { %977 = vmatpush3.bf16.msra.mxu0 %v1112_v5  ;;  %v1121_v14 = vld [vmem:[#allocation5 + $0xd8] sm:$0xff]   ;;  %v1125_v18 = vld [vmem:[#allocation5 + $0xe0] sm:$0xff]   ;;  %v1128_v21 = vld [vmem:[#allocation5 + $0x28] sm:$0xff]  }
  0x3e   :  { %978 = vmatprep.subr.bf16.mxu0 %v1115_v8  ;;  %v1122_v15 = vld [vmem:[#allocation5 + $0x98] sm:$0xff]   ;;  %v1126_v19 = vld [vmem:[#allocation5 + $0xa0] sm:$0xff]   ;;  %v1129_v22 = vld [vmem:[#allocation5 + $0xe8] sm:$0xff]   ;;  %p1266_p0 = pnand %p1265_p13, %p1259_p10 }
  0x3f   :  { %1005 = vmatpush3.bf16.msra.mxu1 %v1114_v7  ;;  %v1130_v23 = vld [vmem:[#allocation5 + $0xa8] sm:$0xff]   ;;  %v1131_v24 = vld [vmem:[#allocation5 + $0x70] sm:$0xff]   ;;  %v1135_v28 = vld [vmem:[#allocation5 + $0x78] sm:$0xff]  }
  0x40   :  { %1006 = vmatprep.subr.bf16.mxu1 %v1117_v10  ;;  %v1132_v25 = vld [vmem:[#allocation5 + $0x30] sm:$0xff]   ;;  %v1136_v29 = vld [vmem:[#allocation5 + $0x38] sm:$0xff]   ;;  %v1142_v34 = vld [vmem:[#allocation5 + $0x140] sm:$0xff]  }
  0x41   :  { %979 = vmatpush3.bf16.msra.mxu0 %v1116_v9  ;;  %v1133_v26 = vld [vmem:[#allocation5 + $0xf0] sm:$0xff]   ;;  %v1137_v30 = vld [vmem:[#allocation5 + $0xf8] sm:$0xff]   ;;  %v1146_v37 = vld [vmem:[#allocation5 + $0x100] sm:$0xff]  }
  0x42   :  { %980 = vmatprep.subr.bf16.mxu0 %v1119_v12  ;;  %v1134_v27 = vld [vmem:[#allocation5 + $0xb0] sm:$0xff]   ;;  %v1141_v33 = vld [vmem:[#allocation5 + $0xb8] sm:$0xff]   ;;  %v1147_v38 = vld [vmem:[#allocation5 + $0x148] sm:$0xff]  }
  0x43   :  { %1007 = vmatpush3.bf16.msra.mxu1 %v1118_v11  ;;  %v1138_v31 = vld [vmem:[#allocation2] ss:$28 sps:$4 sm:$0xff]   ;;  %v1143_v35 = vld [vmem:[#allocation2 + $0x8] ss:$28 sps:$4 sm:$0xff]   ;;  %v1158_v45 = vld [vmem:[#allocation2 + $0x38] ss:$28 sps:$4 sm:$0xff]  }
  0x44   :  { %1008 = vmatprep.subr.bf16.mxu1 %v1121_v14  ;;  %v1140_v32 = vld [vmem:[#allocation2 + $0x4] ss:$28 sps:$4 sm:$0xff]   ;;  %v1145_v36 = vld [vmem:[#allocation2 + $0xc] ss:$28 sps:$4 sm:$0xff]   ;;  %v1148_v39 = vld [vmem:[#allocation5 + $0x108] sm:$0xff]  }
  0x45   :  { %981 = vmatpush3.bf16.msra.mxu0 %v1120_v13  ;;  %587 = vmatprep.mubr.bf16.mxu0 %v1140_v32  ;;  %v1149_v40 = vld [vmem:[#allocation5 + $0x150] sm:$0xff]   ;;  %v1151_v42 = vld [vmem:[#allocation5 + $0x158] sm:$0xff]   ;;  %v1155_v43 = vld [vmem:[#allocation2 + $0x3c] ss:$28 sps:$4 sm:$0xff]  }
  0x46   :  { %982 = vmatprep.subr.bf16.mxu0 %v1123_v16  ;;  %636 = vmatprep.mubr.bf16.mxu1 %v1145_v36  ;;  %v1150_v41 = vld [vmem:[#allocation5 + $0x110] sm:$0xff]   ;;  %v1152_v44 = vld [vmem:[#allocation5 + $0x118] sm:$0xff]   ;;  %v1153_v46 = vld [vmem:[#allocation5 + $0x160] sm:$0xff]  }
  0x47   :  { %1009 = vmatpush3.bf16.msra.mxu1 %v1122_v15  ;;  %v1160_v47 = vld [vmem:[#allocation2 + $0x44] ss:$28 sps:$4 sm:$0xff]   ;;  %v1154_v49 = vld [vmem:[#allocation5 + $0x120] sm:$0xff]   ;;  %v1157_v50 = vld [vmem:[#allocation5 + $0x168] sm:$0xff]  }
  0x48   :  { %1010 = vmatprep.subr.bf16.mxu1 %v1125_v18  ;;  %v1162_v48 = vld [vmem:[#allocation2 + $0x40] ss:$28 sps:$4 sm:$0xff]   ;;  %v1165_v51 = vld [vmem:[#allocation5 + $0x180] sm:$0xff]   ;;  %v1166_v58 = vld [vmem:[#allocation5 + $0x178] sm:$0xff]  }
  0x49   :  { %983 = vmatpush3.bf16.msra.mxu0 %v1124_v17  ;;  %v1159_v52 = vld [vmem:[#allocation5 + $0x128] sm:$0xff]   ;;  %v1163_v53 = vld [vmem:[#allocation5 + $0x170] sm:$0xff]   ;;  %v1170_v54 = vld [vmem:[#allocation2 + $0x14] ss:$28 sps:$4 sm:$0xff]  }
  0x4a   :  { %984 = vmatprep.subr.bf16.mxu0 %v1127_v20  ;;  %v1171_v55 = vld [vmem:[#allocation2 + $0x18] ss:$28 sps:$4 sm:$0xff]   ;;  %v1172_v56 = vld [vmem:[#allocation2 + $0x50] ss:$28 sps:$4 sm:$0xff]   ;;  %v1164_v57 = vld [vmem:[#allocation5 + $0x130] sm:$0xff]  }
  0x4b   :  { %1011 = vmatpush3.bf16.msra.mxu1 %v1126_v19  ;;  %v1167_v59 = vld [vmem:[#allocation5 + $0x138] sm:$0xff]   ;;  %v1176_v63 = vld [vmem:[#allocation7] sm:$0xff]   ;;  %v1177_v0 = vld [vmem:[#allocation7 + $0x8] sm:$0xff]  }
  0x4c   :  { %1012 = vmatprep.subr.bf16.mxu1 %v1129_v22  ;;  %v1168_v60 = vld [vmem:[#allocation2 + $0x10] ss:$28 sps:$4 sm:$0xff]   ;;  %v1175_v62 = vld [vmem:[#allocation2 + $0x48] ss:$28 sps:$4 sm:$0xff]   ;;  %v1180_v3 = vld [vmem:[#allocation7 + $0x20] sm:$0xff]  }
  0x4d   :  { %985 = vmatpush3.bf16.msra.mxu0 %v1128_v21  ;;  %v1173_v61 = vld [vmem:[#allocation2 + $0x4c] ss:$28 sps:$4 sm:$0xff]   ;;  %v1179_v2 = vld [vmem:[#allocation7 + $0x18] sm:$0xff]   ;;  %v1181_v4 = vld [vmem:[#allocation7 + $0x28] sm:$0xff]  }
  0x4e   :  { %986 = vmatprep.subr.bf16.mxu0 %v1131_v24  ;;  %v1178_v1 = vld [vmem:[#allocation7 + $0x10] sm:$0xff]   ;;  %v1183_v6 = vld [vmem:[#allocation7 + $0x38] sm:$0xff]   ;;  %v899_v8 = vld [vmem:[%s1388_s2] ss:$0 sm:$0xff] }
  0x4f   :  { %1013 = vmatpush3.bf16.msra.mxu1 %v1130_v23  ;;  %v1182_v5 = vld [vmem:[#allocation7 + $0x30] sm:$0xff]  }
  0x50   :  { %1014 = vmatprep.subr.bf16.mxu1 %v1133_v26 }
  0x51   :  { %987 = vmatpush3.bf16.msra.mxu0 %v1132_v25 }
  0x52   :  { %988 = vmatprep.subr.bf16.mxu0 %v1135_v28 }
  0x53   :  { %1015 = vmatpush3.bf16.msra.mxu1 %v1134_v27 }
  0x54   :  { %1016 = vmatprep.subr.bf16.mxu1 %v1137_v30 }
  0x55   :  { %989 = vmatpush3.bf16.msra.mxu0 %v1136_v29 }
  0x56   :  { %1030 = vmatprep.subr.bf16.mxu0 %v1142_v34 }
  0x57   :  { %1017 = vmatpush3.bf16.msra.mxu1 %v1141_v33 }
  0x58   :  { %588 = vmatmul.mubr.bf16.vlgmr.msra.gmra.mrb[0].mxu0 %v1138_v31  ;;  %1071 = vmatprep.subr.bf16.mxu1 %v1165_v51 }
  0x59   :  { %1031 = vmatpush3.bf16.msra.mxu0 %v1146_v37  ;;  %595 = vmatprep.mubr.bf16.mxu0 %v1155_v43 }
  0x5a   :  { %637 = vmatmul.mubr.bf16.vlgmr.msra.gmra.mrb[0].mxu1 %v1143_v35  ;;  %1032 = vmatprep.subr.bf16.mxu0 %v1147_v38 }
  0x5b   :  { %644 = vmatprep.mubr.bf16.mxu1 %v1160_v47  ;;  %1072 = vmatpush3.bf16.msra.mxu1 %v1165_v51 }
  0x5c   :  { %1077 = vmatprep.subr.bf16.mxu1 %v1176_v63 }
  0x5d   :  { %1033 = vmatpush3.bf16.msra.mxu0 %v1148_v39 }
  0x5e   :  { %1034 = vmatprep.subr.bf16.mxu0 %v1149_v40 }
  0x60   :  { %596 = vmatmul.mubr.bf16.gmra.mrb[4].mxu0 %v1158_v45 }
  0x61   :  { %1035 = vmatpush3.bf16.msra.mxu0 %v1150_v41  ;;  %685 = vmatprep.mubr.bf16.mxu0 %v1170_v54 }
  0x62   :  { %1036 = vmatprep.subr.bf16.mxu0 %v1151_v42  ;;  %645 = vmatmul.mubr.bf16.gmra.mrb[4].mxu1 %v1162_v48 }
  0x63   :  { %1073 = vmatprep.mubr.msk.bf16.mxu1 %vm548_vm0, %v1171_v55 }
  0x65   :  { %1037 = vmatpush3.bf16.msra.mxu0 %v1152_v44 }
  0x66   :  { %1038 = vmatprep.subr.bf16.mxu0 %v1153_v46 }
  0x69   :  { %1039 = vmatpush3.bf16.msra.mxu0 %v1154_v49 }
  0x6a   :  { %1040 = vmatprep.subr.bf16.mxu0 %v1157_v50  ;;  %1074 = vmatmul.mubr.msk.bf16.vlgmr.msra.gmra.mrb[8].mxu1 %vm548_vm0, %v1172_v56 }
  0x6b   :  { %1078 = vmatpush3.bf16.msra.mxu1 %v1176_v63 }
  0x6c   :  { %1079 = vmatprep.subr.bf16.mxu1 %v1177_v0 }
  0x6d   :  { %1041 = vmatpush3.bf16.msra.mxu0 %v1159_v52 }
  0x6e   :  { %1042 = vmatprep.subr.bf16.mxu0 %v1163_v53 }
  0x6f   :  { %1080 = vmatpush3.bf16.msra.mxu1 %v1177_v0 }
  0x70   :  { %1081 = vmatprep.subr.bf16.mxu1 %v1178_v1 }
  0x71   :  { %1043 = vmatpush3.bf16.msra.mxu0 %v1164_v57 }
  0x72   :  { %1044 = vmatprep.subr.bf16.mxu0 %v1166_v58 }
  0x73   :  { %1082 = vmatpush3.bf16.msra.mxu1 %v1178_v1 }
  0x74   :  { %1083 = vmatprep.subr.bf16.mxu1 %v1179_v2 }
  0x75   :  { %1045 = vmatpush3.bf16.msra.mxu0 %v1167_v59 }
  0x77   :  { %1084 = vmatpush3.bf16.msra.mxu1 %v1179_v2 }
  0x78   :  { %686 = vmatmul.mubr.bf16.vlgmr.msra.gmra.mrb[8].mxu0 %v1168_v60  ;;  %1085 = vmatprep.subr.bf16.mxu1 %v1180_v3 }
  0x79   :  { %693 = vmatprep.mubr.bf16.mxu0 %v1173_v61 }
  0x7b   :  { %1086 = vmatpush3.bf16.msra.mxu1 %v1180_v3 }
  0x7c   :  { %1087 = vmatprep.subr.bf16.mxu1 %v1181_v4 }
  0x7f   :  { %1088 = vmatpush3.bf16.msra.mxu1 %v1181_v4 }
  0x80   :  { %694 = vmatmul.mubr.bf16.gmra.mrb[12].mxu0 %v1175_v62  ;;  %1089 = vmatprep.subr.bf16.mxu1 %v1182_v5 }
  0x83   :  { %1090 = vmatpush3.bf16.msra.mxu1 %v1182_v5 }
  0x84   :  { %1091 = vmatprep.subr.bf16.mxu1 %v1183_v6 }
  0x87   :  { %1092 = vmatpush3.bf16.msra.mxu1 %v1183_v6  ;;  %v965_v6 = vld [vmem:[%s1390_s4] ss:$0 sm:$0xff] }
 0x12b   :  { %v990_v7 = vpop.f32.mrb[0].mxu0 }
 0x12c   :  { %v991_v9 = vpop.f32.mrb[1].mxu0 }
 0x12d   :  { %v992_v10 = vadd.f32 %v991_v9, %v990_v7  ;;  %v993_v11 = vpop.f32.mrb[2].mxu0  ;;  %v1018_v12 = vpop.f32.mrb[0].mxu1 }
 0x12e   :  { %v994_v13 = vpop.f32.mrb[3].mxu0  ;;  %v1019_v16 = vpop.f32.mrb[1].mxu1 }
 0x12f   :  { %v590_v14 = vadd.f32 %v992_v10, %v899_v8  ;;  %v995_v15 = vadd.f32 %v994_v13, %v993_v11  ;;  %v1020_v17 = vadd.f32 %v1019_v16, %v1018_v12  ;;  %v1021_v18 = vpop.f32.mrb[2].mxu1 }
 0x130   :  { %v1022_v20 = vpop.f32.mrb[3].mxu1 }
 0x131   :  { %v593_v19 = vadd.f32 %v995_v15, %v899_v8  ;;  %v639_v21 = vadd.f32 %v1020_v17, %v590_v14  ;;  %v1023_v22 = vadd.f32 %v1022_v20, %v1021_v18 }
 0x133   :  { %v642_v23 = vadd.f32 %v1023_v22, %v593_v19  ;;  %v996_v24 = vpop.f32.mrb[4].mxu0 }
 0x134   :  { %v997_v25 = vpop.f32.mrb[5].mxu0 }
 0x135   :  { %v998_v26 = vadd.f32 %v997_v25, %v996_v24  ;;  %v999_v27 = vpop.f32.mrb[6].mxu0  ;;  %v1024_v28 = vpop.f32.mrb[4].mxu1 }
 0x136   :  { %v1000_v29 = vpop.f32.mrb[7].mxu0  ;;  %v1025_v32 = vpop.f32.mrb[5].mxu1 }
 0x137   :  { %v598_v30 = vadd.f32 %v998_v26, %v899_v8  ;;  %v1001_v31 = vadd.f32 %v1000_v29, %v999_v27  ;;  %v1026_v33 = vadd.f32 %v1025_v32, %v1024_v28  ;;  %v1027_v34 = vpop.f32.mrb[6].mxu1 }
 0x138   :  { %v1028_v36 = vpop.f32.mrb[7].mxu1 }
 0x139   :  { %v601_v35 = vadd.f32 %v1001_v31, %v899_v8  ;;  %v647_v37 = vadd.f32 %v1026_v33, %v598_v30  ;;  %v1029_v38 = vadd.f32 %v1028_v36, %v1027_v34 }
 0x13b   :  { %v650_v39 = vadd.f32 %v1029_v38, %v601_v35 }
 0x13d   :  { %v1075_v40 = vpop.f32.mrb[8].mxu1 }
 0x13e   :  { %v736_v41 = vpop.f32.mrb[9].mxu1 }
 0x13f   :  { %v1076_v42 = vpop.f32.mrb[10].mxu1 }
 0x140   :  { %v739_v43 = vpop.f32.mrb[11].mxu1 }
 0x14b   :  { %v1046_v44 = vpop.f32.mrb[8].mxu0 }
 0x14c   :  { %v1047_v45 = vpop.f32.mrb[9].mxu0 }
 0x14d   :  { %v1048_v46 = vadd.f32 %v1047_v45, %v1046_v44  ;;  %v1049_v47 = vpop.f32.mrb[10].mxu0 }
 0x14e   :  { %v1050_v48 = vpop.f32.mrb[11].mxu0 }
 0x14f   :  { %v1051_v49 = vadd.f32 %v1050_v48, %v1049_v47  ;;  %v688_v50 = vadd.f32 %v1048_v46, %v639_v21 }
 0x151   :  { %v737_v51 = vadd.f32 %v736_v41, %v688_v50  ;;  %v691_v52 = vadd.f32 %v1051_v49, %v642_v23 }
 0x153   :  { %v740_v53 = vadd.f32 %v739_v43, %v691_v52  ;;  %v1052_v54 = vpop.f32.mrb[12].mxu0  ;;  %1184 = vtanh.f32 %v737_v51 }
 0x154   :  { %v1053_v55 = vpop.f32.mrb[13].mxu0 }
 0x155   :  { %1186 = vtanh.f32 %v740_v53  ;;  %v1054_v56 = vadd.f32 %v1053_v55, %v1052_v54  ;;  %v1055_v57 = vpop.f32.mrb[14].mxu0 }
 0x156   :  { %v1056_v58 = vpop.f32.mrb[15].mxu0 }
 0x157   :  { %v696_v59 = vadd.f32 %v1054_v56, %v647_v37  ;;  %v1057_v60 = vadd.f32 %v1056_v58, %v1055_v57 }
 0x159   :  { %v745_v61 = vadd.f32 %v1075_v40, %v696_v59  ;;  %v699_v62 = vadd.f32 %v1057_v60, %v650_v39 }
 0x15b   :  { %v748_v63 = vadd.f32 %v1076_v42, %v699_v62  ;;  %1188 = vtanh.f32 %v745_v61 }
 0x15d   :  { %1190 = vtanh.f32 %v748_v63  ;;  %v1185_v0 = vpop.eup %1184 }
 0x15f   :  { %v1187_v1 = vpop.eup %1186 }
 0x160   :  { %v755_v2 = vpack.c.bf16 %v1187_v1, %v1185_v0 }
 0x162   :  { %1093 = vmatprep.mubr.bf16.mxu1 %v755_v2 }
 0x165   :  { %v1189_v3 = vpop.eup %1188 }
 0x167   :  { %v1191_v4 = vpop.eup %1190 }
 0x168   :  { %v756_v5 = vpack.c.bf16 %v1191_v4, %v1189_v3 }
 0x16a   :  { %1094 = vmatmul.mubr.bf16.vlgmr.msra.gmra.mrb[12].mxu1 %v756_v5 }
 0x23d   :  { %v1095_v7 = vpop.f32.mrb[12].mxu1 }
 0x23e   :  { %v871_v8 = vadd.f32 %v1095_v7, %v965_v6  ;;  %v862_v9 = vpop.f32.mrb[13].mxu1 }
 0x23f   :  { %v863_v10 = vadd.f32 %v965_v6, %v862_v9  ;;  %v1096_v11 = vpop.f32.mrb[14].mxu1 }
 0x240   :  { %879 = vst [vmem:[#allocation8 + $0x10] sm:$0xff] %v871_v8  ;;  %v874_v12 = vadd.f32 %v1096_v11, %v965_v6  ;;  %v865_v13 = vpop.f32.mrb[15].mxu1 }
 0x241   :  { %877 = vst [vmem:[#allocation8] sm:$0xff] %v863_v10  ;;  %v866_v14 = vadd.f32 %v965_v6, %v865_v13 }
 0x242   :  { %880 = vst [vmem:[#allocation8 + $0x18] sm:$0xff] %v874_v12 }
 0x243   :  { %878 = vst [vmem:[#allocation8 + $0x8] sm:$0xff] %v866_v14 }
 0x244   :  { %1269 = shalt.err (!%p1266_p0)
}
 0x245   :  { %s1270_s12 = scalar_lea.hbm %s1391_s5, 512 }
 0x246   :  { %p1271_p1 = scmp.ne.s32.totalorder %s1391_s5, %s1270_s12  ;;  %p1274_p2 = scmp.lt.u32.totalorder %s1270_s12, %s1391_s5 }
 0x248   :  { %p1276_p3 = pnand %p1274_p2, %p1271_p1 }
 0x24a   :  { %1279 = shalt.err (!%p1276_p3)
}
 0x24b   :  { %s1294_s1 = smov 128   ;;  %s1295_s17 = smov 8  }
 0x24c   :  { %892 = dma.vmem_to_hbm [thread:$0]  %s887_s9, 512, %s1391_s5, [#allocation4], %s1294_s1, %s1294_s1, %s1295_s17  }
 0x24d   :  { %1284 = dma.done.wait [#allocation4], 512  }
 0x24e   :  { %1285 = vsyncadd [#allocation4], 4294966784 }
 0x24f   :  { %896 = vsyncpa [#allocation3], 1 }
 0x250   :  { %897 = vsyncpa [#allocation6], 1 }
 0x251   :  { %898 = vsyncpa [#allocation4], 1 }

</bundles_post_ra>
